<compile_context>
chip_gen: v5e
topology: v5e:2x2
jax: 0.10.0
libtpu: 0.0.40
codegen_flags: <defaults>
</compile_context>

<pallas_src>
import jax
import jax.numpy as jnp
from jax.experimental import pallas as pl
from jax.experimental.pallas import tpu as pltpu  # noqa: F401  (TPU backend)

# ----------------------------- configuration --------------------------------
B = 2            # batch
N = 16           # sequence length (tokens)
DIM = 32         # embedding dim C
HEADS = 4        # num_heads
HD = DIM // HEADS            # head dim = 8
SCALE = HD ** -0.5           # qk_scale default: head_dim ** -0.5


# ------------------------------ Pallas kernel --------------------------------
def attention_kernel(x_ref, wqkv_ref, bqkv_ref, wp_ref, bp_ref, o_ref):
    """Fused multi-head attention for the whole (B*N, C) activation slab.

    x_ref    : (B*N, C)   activations, batch folded into rows
    wqkv_ref : (C, 3C)    fused qkv weight, q-columns pre-scaled by qk_scale
    bqkv_ref : (1, 3C)    fused qkv bias,   q-part   pre-scaled by qk_scale
    wp_ref   : (C, C)     output projection weight
    bp_ref   : (1, C)     output projection bias
    o_ref    : (B*N, C)
    """
    x = x_ref[...]                                                    # (32, 32)

    # ---- fused QKV projection: one lane-dense K=32 MXU matmul ----
    qkv = jnp.dot(x, wqkv_ref[...],
                  preferred_element_type=jnp.float32) + bqkv_ref[...]  # (32, 96)
    qkv = qkv.reshape(B, N, 3 * DIM)                                  # (2, 16, 96)

    # ---- split heads into a (B*H, N, HD) batch (cheap lane slices + stack) ----
    def split_heads(base):
        cols = [qkv[:, :, base + h * HD: base + (h + 1) * HD]
                for h in range(HEADS)]                                # each (2, 16, 8)
        return jnp.stack(cols, axis=1).reshape(B * HEADS, N, HD)      # (8, 16, 8)

    q = split_heads(0)           # qk scale already folded into wqkv / bqkv
    k = split_heads(DIM)
    v = split_heads(2 * DIM)

    # ---- attention core, batched over g = (batch, head) ----
    s = jnp.einsum('gnd,gmd->gnm', q, k,
                   preferred_element_type=jnp.float32)                # (8, 16, 16)
    s = s - jnp.max(s, axis=-1, keepdims=True)
    p = jnp.exp(s)
    p = p * pl.reciprocal(jnp.sum(p, axis=-1, keepdims=True), approx=True)
    # attn_drop: ratio 0.0 -> identity
    o = jnp.einsum('gnm,gmd->gnd', p, v,
                   preferred_element_type=jnp.float32)                # (8, 16, 8)

    # ---- merge heads back into lanes, single K=32 output projection ----
    o = o.reshape(B, HEADS, N, HD)
    o2d = jnp.concatenate([o[:, h] for h in range(HEADS)],
                          axis=-1).reshape(B * N, DIM)                # (32, 32)
    o_ref[...] = jnp.dot(o2d, wp_ref[...],
                         preferred_element_type=jnp.float32) + bp_ref[...]
    # proj_drop: ratio 0.0 -> identity


# ------------------------------ pallas wrapper --------------------------------
def attention_pallas(x, kp):
    b, n, c = x.shape
    x2d = x.reshape(b * n, c)        # host-side reshape, outside the kernel
    out2d = pl.pallas_call(
        attention_kernel,
        out_shape=jax.ShapeDtypeStruct((b * n, c), jnp.float32),
        # No grid / BlockSpecs: single invocation, whole arrays in VMEM.
    )(x2d, kp['w_qkv'], kp['b_qkv'], kp['w_proj'], kp['b_proj'])
    return out2d.reshape(b, n, c)


# -------------------------- host-side weight layout ---------------------------
def init_params(key):
    """Canonical (PyTorch-equivalent, x @ W convention) parameters."""
    k1, k2, k3, k4 = jax.random.split(key, 4)
    f32 = jnp.float32
    return {
        'w_qkv': jax.random.normal(k1, (DIM, 3 * DIM), f32) * 0.08,
        'b_qkv': jax.random.normal(k2, (3 * DIM,), f32) * 0.02,   # qkv_bias=True
        'w_proj': jax.random.normal(k3, (DIM, DIM), f32) * 0.08,
        'b_proj': jax.random.normal(k4, (DIM,), f32) * 0.02,
    }


def prep_kernel_params(p):
    """One-time host-side weight prep: fold the qk scale into the q columns and
    shape the biases as 2-D rows for lane-broadcast inside the kernel."""
    scale_cols = jnp.concatenate([
        jnp.full((DIM,), SCALE, jnp.float32),   # q columns get the scale
        jnp.ones((2 * DIM,), jnp.float32),      # k, v columns unchanged
    ])
    return {
        'w_qkv': p['w_qkv'] * scale_cols[None, :],              # (C, 3C)
        'b_qkv': (p['b_qkv'] * scale_cols).reshape(1, 3 * DIM),  # (1, 3C)
        'w_proj': p['w_proj'],                                   # (C, C)
        'b_proj': p['b_proj'].reshape(1, DIM),                   # (1, C)
    }


# ------------------------------ reference (pure JAX) --------------------------
def ref_attention(x, p):
    """Mirror of the PyTorch Attention.forward (dropout ratio 0)."""
    b, n, c = x.shape
    qkv = x @ p['w_qkv'] + p['b_qkv']                          # (B, N, 3C)
    qkv = qkv.reshape(b, n, 3, HEADS, HD).transpose(2, 0, 3, 1, 4)
    q, k, v = qkv[0], qkv[1], qkv[2]                           # (B, H, N, hd)
    attn = jax.nn.softmax((q @ jnp.swapaxes(k, -2, -1)) * SCALE, axis=-1)
    o = (attn @ v).transpose(0, 2, 1, 3).reshape(b, n, c)
    return o @ p['w_proj'] + p['b_proj']


# ------------------------------------ main ------------------------------------
if __name__ == "__main__":
    key = jax.random.PRNGKey(0)
    k_x, k_p = jax.random.split(key)
    x = jax.random.normal(k_x, (B, N, DIM), dtype=jnp.float32)

    params = init_params(k_p)
    kparams = prep_kernel_params(params)

    out = jax.block_until_ready(attention_pallas(x, kparams))
    ref = jax.block_until_ready(ref_attention(x, params))

    assert out.shape == (B, N, DIM), out.shape
    assert jnp.allclose(out, ref, atol=2e-3, rtol=2e-3), (
        f"max abs diff {float(jnp.max(jnp.abs(out - ref)))}")
    print("KERNEL_OK")
</pallas_src>

<mosaic_0001>
module attributes {stable_mosaic.version = 11 : i64} {
  func.func @attention_kernel(%arg0: memref<32x32xf32, #tpu.memory_space<vmem>>, %arg1: memref<32x96xf32, #tpu.memory_space<vmem>>, %arg2: memref<1x96xf32, #tpu.memory_space<vmem>>, %arg3: memref<32x32xf32, #tpu.memory_space<vmem>>, %arg4: memref<1x32xf32, #tpu.memory_space<vmem>>, %arg5: memref<32x32xf32, #tpu.memory_space<vmem>>) attributes {dimension_semantics = [], scalar_prefetch = 0 : i64, scratch_operands = 0 : i64, tpu.core_type = #tpu.core_type<tc>} {
    %c0 = arith.constant 0 : index
    %c0_0 = arith.constant 0 : index
    %0 = vector.load %arg0[%c0, %c0_0] : memref<32x32xf32, #tpu.memory_space<vmem>>, vector<32x32xf32>
    %c0_1 = arith.constant 0 : index
    %c0_2 = arith.constant 0 : index
    %1 = vector.load %arg1[%c0_1, %c0_2] : memref<32x96xf32, #tpu.memory_space<vmem>>, vector<32x96xf32>
    %cst = arith.constant dense<0.000000e+00> : vector<32x96xf32>
    %2 = tpu.matmul %0, %1, %cst {dimension_numbers = #tpu.dot_dimension_numbers<[1], [0], [0], [1], [0, 0, 1, 1], [], []>} : vector<32x32xf32>, vector<32x96xf32>, vector<32x96xf32> -> vector<32x96xf32>
    %c0_3 = arith.constant 0 : index
    %c0_4 = arith.constant 0 : index
    %3 = vector.load %arg2[%c0_3, %c0_4] : memref<1x96xf32, #tpu.memory_space<vmem>>, vector<1x96xf32>
    %4 = vector.broadcast %3 : vector<1x96xf32> to vector<32x96xf32>
    %5 = arith.addf %2, %4 : vector<32x96xf32>
    %6 = vector.shape_cast %5 : vector<32x96xf32> to vector<2x16x96xf32>
    %7 = vector.extract_strided_slice %6 {offsets = [0, 0, 0], sizes = [2, 16, 8], strides = [1, 1, 1]} : vector<2x16x96xf32> to vector<2x16x8xf32>
    %8 = vector.extract_strided_slice %6 {offsets = [0, 0, 8], sizes = [2, 16, 8], strides = [1, 1, 1]} : vector<2x16x96xf32> to vector<2x16x8xf32>
    %9 = vector.extract_strided_slice %6 {offsets = [0, 0, 16], sizes = [2, 16, 8], strides = [1, 1, 1]} : vector<2x16x96xf32> to vector<2x16x8xf32>
    %10 = vector.extract_strided_slice %6 {offsets = [0, 0, 24], sizes = [2, 16, 8], strides = [1, 1, 1]} : vector<2x16x96xf32> to vector<2x16x8xf32>
    %11 = vector.shape_cast %7 : vector<2x16x8xf32> to vector<2x1x16x8xf32>
    %12 = vector.shape_cast %8 : vector<2x16x8xf32> to vector<2x1x16x8xf32>
    %13 = vector.shape_cast %9 : vector<2x16x8xf32> to vector<2x1x16x8xf32>
    %14 = vector.shape_cast %10 : vector<2x16x8xf32> to vector<2x1x16x8xf32>
    %15 = tpu.concatenate %11, %12, %13, %14 in 1 : vector<2x1x16x8xf32>, vector<2x1x16x8xf32>, vector<2x1x16x8xf32>, vector<2x1x16x8xf32> -> vector<2x4x16x8xf32>
    %16 = vector.shape_cast %15 : vector<2x4x16x8xf32> to vector<8x16x8xf32>
    %17 = vector.extract_strided_slice %6 {offsets = [0, 0, 32], sizes = [2, 16, 8], strides = [1, 1, 1]} : vector<2x16x96xf32> to vector<2x16x8xf32>
    %18 = vector.extract_strided_slice %6 {offsets = [0, 0, 40], sizes = [2, 16, 8], strides = [1, 1, 1]} : vector<2x16x96xf32> to vector<2x16x8xf32>
    %19 = vector.extract_strided_slice %6 {offsets = [0, 0, 48], sizes = [2, 16, 8], strides = [1, 1, 1]} : vector<2x16x96xf32> to vector<2x16x8xf32>
    %20 = vector.extract_strided_slice %6 {offsets = [0, 0, 56], sizes = [2, 16, 8], strides = [1, 1, 1]} : vector<2x16x96xf32> to vector<2x16x8xf32>
    %21 = vector.shape_cast %17 : vector<2x16x8xf32> to vector<2x1x16x8xf32>
    %22 = vector.shape_cast %18 : vector<2x16x8xf32> to vector<2x1x16x8xf32>
    %23 = vector.shape_cast %19 : vector<2x16x8xf32> to vector<2x1x16x8xf32>
    %24 = vector.shape_cast %20 : vector<2x16x8xf32> to vector<2x1x16x8xf32>
    %25 = tpu.concatenate %21, %22, %23, %24 in 1 : vector<2x1x16x8xf32>, vector<2x1x16x8xf32>, vector<2x1x16x8xf32>, vector<2x1x16x8xf32> -> vector<2x4x16x8xf32>
    %26 = vector.shape_cast %25 : vector<2x4x16x8xf32> to vector<8x16x8xf32>
    %27 = vector.extract_strided_slice %6 {offsets = [0, 0, 64], sizes = [2, 16, 8], strides = [1, 1, 1]} : vector<2x16x96xf32> to vector<2x16x8xf32>
    %28 = vector.extract_strided_slice %6 {offsets = [0, 0, 72], sizes = [2, 16, 8], strides = [1, 1, 1]} : vector<2x16x96xf32> to vector<2x16x8xf32>
    %29 = vector.extract_strided_slice %6 {offsets = [0, 0, 80], sizes = [2, 16, 8], strides = [1, 1, 1]} : vector<2x16x96xf32> to vector<2x16x8xf32>
    %30 = vector.extract_strided_slice %6 {offsets = [0, 0, 88], sizes = [2, 16, 8], strides = [1, 1, 1]} : vector<2x16x96xf32> to vector<2x16x8xf32>
    %31 = vector.shape_cast %27 : vector<2x16x8xf32> to vector<2x1x16x8xf32>
    %32 = vector.shape_cast %28 : vector<2x16x8xf32> to vector<2x1x16x8xf32>
    %33 = vector.shape_cast %29 : vector<2x16x8xf32> to vector<2x1x16x8xf32>
    %34 = vector.shape_cast %30 : vector<2x16x8xf32> to vector<2x1x16x8xf32>
    %35 = tpu.concatenate %31, %32, %33, %34 in 1 : vector<2x1x16x8xf32>, vector<2x1x16x8xf32>, vector<2x1x16x8xf32>, vector<2x1x16x8xf32> -> vector<2x4x16x8xf32>
    %36 = vector.shape_cast %35 : vector<2x4x16x8xf32> to vector<8x16x8xf32>
    "tpu.trace_start"() <{level = 10 : i32, message = "gnd,gmd->gnm"}> : () -> ()
    %cst_5 = arith.constant dense<0.000000e+00> : vector<8x16x16xf32>
    %37 = tpu.matmul %16, %26, %cst_5 {dimension_numbers = #tpu.dot_dimension_numbers<[2], [2], [1], [1], [0, 0, 0, 1, 1, 1], [0], [0]>} : vector<8x16x8xf32>, vector<8x16x8xf32>, vector<8x16x16xf32> -> vector<8x16x16xf32>
    "tpu.trace_stop"() : () -> ()
    %cst_6 = arith.constant dense<0xFF800000> : vector<8x16xf32>
    %38 = vector.multi_reduction <maximumf>, %37, %cst_6 [2] : vector<8x16x16xf32> to vector<8x16xf32>
    %39 = vector.shape_cast %38 : vector<8x16xf32> to vector<8x16x1xf32>
    %40 = vector.broadcast %39 : vector<8x16x1xf32> to vector<8x16x16xf32>
    %41 = arith.subf %37, %40 : vector<8x16x16xf32>
    %42 = math.exp %41 : vector<8x16x16xf32>
    %cst_7 = arith.constant dense<0.000000e+00> : vector<8x16xf32>
    %43 = vector.multi_reduction <add>, %42, %cst_7 [2] : vector<8x16x16xf32> to vector<8x16xf32>
    %44 = vector.shape_cast %43 : vector<8x16xf32> to vector<8x16x1xf32>
    %45 = tpu.reciprocal %44 {approx = true} : vector<8x16x1xf32> -> vector<8x16x1xf32>
    %46 = vector.broadcast %45 : vector<8x16x1xf32> to vector<8x16x16xf32>
    %47 = arith.mulf %42, %46 : vector<8x16x16xf32>
    "tpu.trace_start"() <{level = 10 : i32, message = "gnm,gmd->gnd"}> : () -> ()
    %cst_8 = arith.constant dense<0.000000e+00> : vector<8x16x8xf32>
    %48 = tpu.matmul %47, %36, %cst_8 {dimension_numbers = #tpu.dot_dimension_numbers<[2], [1], [1], [2], [0, 0, 0, 1, 1, 2], [0], [0]>} : vector<8x16x16xf32>, vector<8x16x8xf32>, vector<8x16x8xf32> -> vector<8x16x8xf32>
    "tpu.trace_stop"() : () -> ()
    %49 = vector.shape_cast %48 : vector<8x16x8xf32> to vector<2x4x16x8xf32>
    %50 = vector.extract_strided_slice %49 {offsets = [0, 0, 0, 0], sizes = [2, 1, 16, 8], strides = [1, 1, 1, 1]} : vector<2x4x16x8xf32> to vector<2x1x16x8xf32>
    %51 = vector.shape_cast %50 : vector<2x1x16x8xf32> to vector<2x16x8xf32>
    %52 = vector.extract_strided_slice %49 {offsets = [0, 1, 0, 0], sizes = [2, 1, 16, 8], strides = [1, 1, 1, 1]} : vector<2x4x16x8xf32> to vector<2x1x16x8xf32>
    %53 = vector.shape_cast %52 : vector<2x1x16x8xf32> to vector<2x16x8xf32>
    %54 = vector.extract_strided_slice %49 {offsets = [0, 2, 0, 0], sizes = [2, 1, 16, 8], strides = [1, 1, 1, 1]} : vector<2x4x16x8xf32> to vector<2x1x16x8xf32>
    %55 = vector.shape_cast %54 : vector<2x1x16x8xf32> to vector<2x16x8xf32>
    %56 = vector.extract_strided_slice %49 {offsets = [0, 3, 0, 0], sizes = [2, 1, 16, 8], strides = [1, 1, 1, 1]} : vector<2x4x16x8xf32> to vector<2x1x16x8xf32>
    %57 = vector.shape_cast %56 : vector<2x1x16x8xf32> to vector<2x16x8xf32>
    %58 = tpu.concatenate %51, %53, %55, %57 in 2 : vector<2x16x8xf32>, vector<2x16x8xf32>, vector<2x16x8xf32>, vector<2x16x8xf32> -> vector<2x16x32xf32>
    %59 = vector.shape_cast %58 : vector<2x16x32xf32> to vector<32x32xf32>
    %c0_9 = arith.constant 0 : index
    %c0_10 = arith.constant 0 : index
    %60 = vector.load %arg3[%c0_9, %c0_10] : memref<32x32xf32, #tpu.memory_space<vmem>>, vector<32x32xf32>
    %cst_11 = arith.constant dense<0.000000e+00> : vector<32x32xf32>
    %61 = tpu.matmul %59, %60, %cst_11 {dimension_numbers = #tpu.dot_dimension_numbers<[1], [0], [0], [1], [0, 0, 1, 1], [], []>} : vector<32x32xf32>, vector<32x32xf32>, vector<32x32xf32> -> vector<32x32xf32>
    %c0_12 = arith.constant 0 : index
    %c0_13 = arith.constant 0 : index
    %62 = vector.load %arg4[%c0_12, %c0_13] : memref<1x32xf32, #tpu.memory_space<vmem>>, vector<1x32xf32>
    %63 = vector.broadcast %62 : vector<1x32xf32> to vector<32x32xf32>
    %64 = arith.addf %61, %63 : vector<32x32xf32>
    %c0_14 = arith.constant 0 : index
    %c0_15 = arith.constant 0 : index
    %65 = vector.load %arg5[%c0_14, %c0_15] : memref<32x32xf32, #tpu.memory_space<vmem>>, vector<32x32xf32>
    tpu.vector_store %arg5[%c0_14, %c0_15], %64 {strides = array<i32>} : memref<32x32xf32, #tpu.memory_space<vmem>>, vector<32x32xf32>,
    return
  }
}

</mosaic_0001>

<bundles_post_ra>
// kernel: tpu_custom_call.1
= control target key start
LH: loop header
LB: loop body
LE: loop exit
PB: predicated region body
PF: predicated region fallthrough
CT: control target
= control target key end

     0   :  { %10 = vsyncpa [#allocation3], 0  ;;  %s1694_s0 = inlined_call_operand.hbm [shape: f32[32,32], index: 0, kind: input, shape index: {}]   ;;  %s1695_s1 = inlined_call_operand.hbm [shape: f32[32,96], index: 1, kind: input, shape index: {}]   ;;  %s1696_s2 = inlined_call_operand.vmem [shape: f32[1,96], index: 2, kind: input, shape index: {}]   ;;  %s1697_s3 = inlined_call_operand.hbm [shape: f32[32,32], index: 3, kind: input, shape index: {}]   ;;  %s1698_s4 = inlined_call_operand.vmem [shape: f32[1,32], index: 4, kind: input, shape index: {}]   ;;  %s1699_s5 = inlined_call_operand.hbm [shape: f32[32,32], index: 5, kind: output, shape index: {}]  }
   0x1   :  { %11 = vsyncpa [#allocation6], 0 }
   0x2   :  { %12 = vsyncpa [#allocation4], 0  ;;  %s30_s20 = sshll.u32 %s1695_s1, 4  ;;  %s1299_s21 = smov [#allocation5]   ;;  %s31_s20 = int_to_ptr.hbm [resolvable:$true] %s30_s20 }
   0x3   :  { %s32_s22 = sshll.u32 %s1299_s21, 4  ;;  %s17_s25 = sshll.u32 %s1694_s0, 4  ;;  %s33_s22 = int_to_ptr.vmem [resolvable:$true] %s32_s22  ;;  %s18_s25 = int_to_ptr.hbm [resolvable:$true] %s17_s25 }
   0x4   :  { %s1300_s26 = smov 128   ;;  %s1301_s27 = smov 8  }
   0x5   :  { %38 = dma.hbm_to_vmem [thread:$0]  %s31_s20, 512, %s33_s22, [#allocation6], %s1300_s26, %s1300_s26, %s1301_s27  }
   0x6   :  { %s1302_s28 = smov [#allocation2]   ;;  %s45_s1 = sshll.u32 %s1697_s3, 4  ;;  %s46_s1 = int_to_ptr.hbm [resolvable:$true] %s45_s1 }
   0x7   :  { %s19_s29 = sshll.u32 %s1302_s28, 4  ;;  %s1303_s0 = smov [#allocation7]   ;;  %s20_s29 = int_to_ptr.vmem [resolvable:$true] %s19_s29 }
   0x8   :  { %25 = dma.hbm_to_vmem [thread:$0]  %s18_s25, 512, %s20_s29, [#allocation3], %s1300_s26, %s1300_s26, %s1301_s27  }
   0x9   :  { %s47_s7 = sshll.u32 %s1303_s0, 4  ;;  %s48_s7 = int_to_ptr.vmem [resolvable:$true] %s47_s7 }
   0xa   :  { %53 = dma.hbm_to_vmem [thread:$0]  %s46_s1, 512, %s48_s7, [#allocation6], %s1300_s26, %s1300_s26, %s1301_s27  }
   0xb   :  { %1293 = dma.done.wait [#allocation3], 512  }
   0xc   :  { %1294 = vsyncadd [#allocation3], 4294966784 }
   0xd   :  { %1295 = dma.done.wait [#allocation6], 1024  }
   0xe   :  { %1296 = vsyncadd [#allocation6], 4294966272  ;;  %v75_v0 = vld [vmem:[#allocation5 + $0x18] sm:$0xff]  ;;  %v74_v1 = vld [vmem:[#allocation5 + $0x10] sm:$0xff]  ;;  %vm80_vm0 = vcmask 261120   ;;  %s1304_s9 = smov 104  }
   0xf   :  { %105 = vmatpush.msra.mxu0 %v75_v0  ;;  %v73_v2 = vld [vmem:[#allocation5 + $0x8] sm:$0xff]  ;;  %v72_v3 = vld [vmem:[#allocation5] sm:$0xff]  ;;  %v70_v6 = vld [vmem:[#allocation2 + $0x10] sm:$0xff]  ;;  %s1305_s10 = smov 112   ;;  %s1306_s11 = smov 120   ;;  %vm154_vm1 = vcmask 64512  }
  0x10   :  { %v68_v4 = vld [vmem:[#allocation2] sm:$0xff]  ;;  %v69_v5 = vld [vmem:[#allocation2 + $0x8] sm:$0xff]  ;;  %v71_v7 = vld [vmem:[#allocation2 + $0x18] sm:$0xff]  ;;  %s1308_s12 = smov 64   ;;  %vm431_vm2 = vcmask 130048   ;;  %s1309_s13 = smov 24  }
  0x11   :  { %106 = vmatpush.msra.mxu0 %v74_v1  ;;  %v1131_v9 = vld [vmem:[%s1696_s2] ss:$0 sm:$0xff]  ;;  %s1307_s2 = smov 96   ;;  %s1310_s14 = smov 16   ;;  %vm944_vm3 = vcmask 195584  }
  0x12   :  { %s1311_s17 = smov [#allocation8]   ;;  %s1008_s21 = sshll.u32 %s1699_s5, 4  ;;  %s1009_s21 = int_to_ptr.hbm [resolvable:$true] %s1008_s21 }
  0x13   :  { %107 = vmatpush.msra.mxu0 %v73_v2  ;;  %s1006_s18 = sshll.u32 %s1311_s17, 4  ;;  %s1007_s18 = int_to_ptr.vmem [resolvable:$true] %s1006_s18 }
  0x15   :  { %108 = vmatpush.msra.mxu0 %v72_v3 }
  0x16   :  { %1022 = vmatmul.msk.f32.vlgmr.msra.gmra.mxu0 %vm80_vm0, %v68_v4 }
  0x1e   :  { %1023 = vmatmul.msk.f32.gmra.mxu0 %vm80_vm0, %v69_v5 }
  0x26   :  { %1024 = vmatmul.msk.f32.gmra.mxu0 %vm80_vm0, %v70_v6 }
  0x2e   :  { %1025 = vmatmul.msk.f32.gmra.mxu0 %vm80_vm0, %v71_v7 }
  0x93   :  { %v110_v8 = vpop.f32.mrf.mxu0 }
  0x94   :  { %v1373_v13 = vadd.f32 %v1131_v9, %v110_v8 }
  0x9b   :  { %v113_v10 = vpop.f32.mrf.mxu0 }
  0x9c   :  { %v1367_v11 = vadd.f32 %v1131_v9, %v113_v10 }
  0x9e   :  { %144 = vrot.lane.b32.xlu2 %v1367_v11, %s1304_s9  ;;  %136 = vrot.lane.b32.xlu1 %v1367_v11, %s1305_s10 }
  0x9f   :  { %128 = vrot.lane.b32.xlu0 %v1367_v11, %s1306_s11 }
  0xa3   :  { %v116_v12 = vpop.f32.mrf.mxu0 }
  0xa4   :  { %v1378_v14 = vadd.f32 %v1131_v9, %v116_v12 }
  0xa6   :  { %134 = vrot.lane.b32.xlu1 %v1373_v13, %s1305_s10 }
  0xa7   :  { %126 = vrot.lane.b32.xlu0 %v1373_v13, %s1306_s11 }
  0xab   :  { %v119_v15 = vpop.f32.mrf.mxu0 }
  0xac   :  { %v1380_v16 = vadd.f32 %v1131_v9, %v119_v15 }
  0xae   :  { %130 = vrot.lane.b32.xlu1 %v1378_v14, %s1306_s11  ;;  %132 = vrot.lane.b32.xlu2 %v1380_v16, %s1306_s11 }
  0xaf   :  { %142 = vrot.lane.b32.xlu0 %v1373_v13, %s1304_s9 }
  0xb6   :  { %140 = vrot.lane.b32.xlu1 %v1380_v16, %s1305_s10 }
  0xbe   :  { %146 = vrot.lane.b32.xlu1 %v1378_v14, %s1304_s9 }
  0xc6   :  { %150 = vrot.lane.b32.xlu1 %v1373_v13, %s1307_s2 }
  0xf8   :  { %v1390_v17 = vpop.permute.xlu2 %144 }
 0x108   :  { %v1392_v18 = vpop.permute.xlu2 %132 }
 0x109   :  { %328 = vrot.lane.b32.xlu1 %v1392_v18, %s1307_s2 }
 0x110   :  { %v137_v19 = vpop.permute.xlu1 %136 }
 0x111   :  { %v129_v20 = vpop.permute.xlu0 %128  ;;  %v1096_v27 = vpack.i.bf16 %v1390_v17, %v137_v19 }
 0x112   :  { %188 = vrot.lane.b32.xlu2 %v129_v20, %s1307_s2 }
 0x118   :  { %v135_v21 = vpop.permute.xlu1 %134 }
 0x119   :  { %v127_v22 = vpop.permute.xlu0 %126 }
 0x11a   :  { %148 = vrot.lane.b32.xlu2 %v1380_v16, %s1304_s9  ;;  %186 = vrot.lane.b32.xlu0 %v127_v22, %s1307_s2  ;;  %v1091_v32 = vpack.i.bf16 %v127_v22, %v129_v20 }
 0x120   :  { %v131_v23 = vpop.permute.xlu1 %130 }
 0x121   :  { %v143_v26 = vpop.permute.xlu0 %142  ;;  %v1106_v42 = vpack.i.bf16 %v131_v23, %v1392_v18 }
 0x122   :  { %152 = vrot.lane.b32.xlu2 %v1367_v11, %s1307_s2  ;;  %138 = vrot.lane.b32.xlu0 %v1378_v14, %s1305_s10  ;;  %v1101_v39 = vpack.i.bf16 %v143_v26, %v135_v21 }
 0x128   :  { %v1403_v24 = vpop.permute.xlu1 %140 }
 0x129   :  { %363 = vrot.lane.b32.xlu1 %v1403_v24, %s1307_s2 }
 0x12a   :  { %221 = vrot.lane.b32.xlu2 %v135_v21, %s1307_s2  ;;  %223 = vrot.lane.b32.xlu0 %v137_v19, %s1307_s2 }
 0x130   :  { %v1409_v25 = vpop.permute.xlu1 %146 }
 0x131   :  { %396 = vrot.lane.b32.xlu1 %v1409_v25, %s1307_s2 }
 0x132   :  { %258 = vrot.lane.b32.xlu0 %v1390_v17, %s1307_s2  ;;  %256 = vrot.lane.b32.xlu2 %v143_v26, %s1307_s2 }
 0x138   :  { %v151_v31 = vpop.permute.xlu1 %150 }
 0x139   :  { %1097 = vrot.lane.b32.xlu1 %v1096_v27, %s1308_s12 }
 0x13a   :  { %326 = vrot.lane.b32.xlu0 %v131_v23, %s1307_s2 }
 0x16c   :  { %v189_v28 = vpop.permute.xlu2 %188 }
 0x16d   :  { %1030 = vmatpush.xpose.msk.msra.mxu3 %vm154_vm1, %v189_v28 }
 0x174   :  { %v1420_v29 = vpop.permute.xlu2 %148 }
 0x175   :  { %398 = vrot.lane.b32.xlu2 %v1420_v29, %s1307_s2 }
 0x17b   :  { %v329_v34 = vpop.permute.xlu1 %328 }
 0x17c   :  { %v153_v30 = vpop.permute.xlu2 %152 }
 0x17d   :  { %1026 = vmatpush.xpose.msk.msra.mxu1 %vm154_vm1, %v153_v30  ;;  %293 = vrot.lane.b32.xlu2 %v1380_v16, %s1307_s2 }
 0x181   :  { %1027 = vmatpush.xpose.msk.msra.mxu1 %vm154_vm1, %v151_v31 }
 0x184   :  { %1028 = vmatmul.msk.f32.vlgmr.msra.gmra.mxu1 %vm154_vm1, %v1373_v13  ;;  %v222_v38 = vpop.permute.xlu2 %221 }
 0x185   :  { %1092 = vrot.lane.b32.xlu2 %v1091_v32, %s1308_s12 }
 0x18c   :  { %1029 = vmatmul.msk.f32.gmra.mxu1 %vm154_vm1, %v1367_v11  ;;  %v187_v33 = vpop.permute.xlu0 %186  ;;  %v257_v41 = vpop.permute.xlu2 %256 }
 0x18d   :  { %1031 = vmatpush.xpose.msk.msra.mxu3 %vm154_vm1, %v187_v33 }
 0x190   :  { %1032 = vmatmul.msk.f32.vlgmr.msra.gmra.mxu3 %vm154_vm1, %v127_v22 }
 0x194   :  { %v1435_v35 = vpop.permute.xlu0 %138 }
 0x195   :  { %361 = vrot.lane.b32.xlu0 %v1435_v35, %s1307_s2 }
 0x198   :  { %1033 = vmatmul.msk.f32.gmra.mxu3 %vm154_vm1, %v129_v20 }
 0x19b   :  { %v364_v36 = vpop.permute.xlu1 %363 }
 0x19c   :  { %v224_v37 = vpop.permute.xlu0 %223  ;;  %1050 = vmatpush.xpose.msk.msrb.mxu0 %vm154_vm1, %v364_v36 }
 0x19d   :  { %291 = vrot.lane.b32.xlu0 %v1378_v14, %s1307_s2  ;;  %1034 = vmatpush.xpose.msk.msrb.mxu3 %vm154_vm1, %v224_v37 }
 0x1a1   :  { %1035 = vmatpush.xpose.msk.msrb.mxu3 %vm154_vm1, %v222_v38 }
 0x1a3   :  { %v397_v44 = vpop.permute.xlu1 %396 }
 0x1a4   :  { %1036 = vmatmul.msk.f32.vlgmr.msrb.gmra.mxu3 %vm154_vm1, %v135_v21  ;;  %v259_v40 = vpop.permute.xlu0 %258  ;;  %v1111_v21 = vpack.i.bf16 %v1420_v29, %v1403_v24 }
 0x1a5   :  { %1046 = vmatpush.xpose.msk.msra.mxu3 %vm154_vm1, %v329_v34  ;;  %1102 = vrot.lane.b32.xlu0 %v1101_v39, %s1308_s12 }
 0x1a6   :  { %1038 = vmatpush.xpose.msk.msrb.mxu1 %vm154_vm1, %v259_v40 }
 0x1aa   :  { %1039 = vmatpush.xpose.msk.msrb.mxu1 %vm154_vm1, %v257_v41 }
 0x1ab   :  { %v1098_v46 = vpop.permute.xlu1 %1097 }
 0x1ac   :  { %1037 = vmatmul.msk.f32.gmra.mxu3 %vm154_vm1, %v137_v19  ;;  %v327_v43 = vpop.permute.xlu0 %326  ;;  %v1100_v47 = vunpack.i.h.bf16 %v1098_v46  ;;  %v1099_v54 = vunpack.i.l.bf16 %v1098_v46 }
 0x1ad   :  { %1040 = vmatmul.msk.f32.vlgmr.msrb.gmra.mxu1 %vm154_vm1, %v143_v26  ;;  %1107 = vrot.lane.b32.xlu0 %v1106_v42, %s1308_s12 }
 0x1ae   :  { %1047 = vmatpush.xpose.msk.msra.mxu3 %vm154_vm1, %v327_v43 }
 0x1b4   :  { %1048 = vmatmul.msk.f32.vlgmr.msra.gmra.mxu3 %vm154_vm1, %v131_v23 }
 0x1b5   :  { %1041 = vmatmul.msk.f32.gmra.mxu1 %vm154_vm1, %v1390_v17 }
 0x1bc   :  { %1049 = vmatmul.msk.f32.gmra.mxu3 %vm154_vm1, %v1392_v18 }
 0x1cf   :  { %v399_v45 = vpop.permute.xlu2 %398 }
 0x1d0   :  { %1054 = vmatpush.xpose.msk.msra.mxu1 %vm154_vm1, %v399_v45 }
 0x1d4   :  { %1055 = vmatpush.xpose.msk.msra.mxu1 %vm154_vm1, %v397_v44 }
 0x1d7   :  { %v294_v48 = vpop.permute.xlu2 %293  ;;  %1056 = vmatmul.msk.f32.vlgmr.msra.gmra.mxu1 %vm154_vm1, %v1409_v25 }
 0x1d8   :  { %739 = vmatpush.msrb.mxu1 %v1100_v47  ;;  %1042 = vmatpush.xpose.msk.msra.mxu2 %vm154_vm1, %v294_v48 }
 0x1df   :  { %v1093_v49 = vpop.permute.xlu2 %1092  ;;  %1057 = vmatmul.msk.f32.gmra.mxu1 %vm154_vm1, %v1420_v29 }
 0x1e0   :  { %v1094_v50 = vunpack.i.l.bf16 %v1093_v49  ;;  %v1095_v51 = vunpack.i.h.bf16 %v1093_v49 }
 0x1e2   :  { %669 = vmatpush.msrb.mxu3 %v1094_v50 }
 0x1e4   :  { %670 = vmatpush.msrb.mxu3 %v1095_v51 }
 0x201   :  { %v1467_v52 = vpop.f32.mrf.mxu1 }
 0x202   :  { %v432_v53 = vsel %vm431_vm2, %v1467_v52, -inf }
 0x203   :  { %433 = vmax.xlane.f32.xlu0 %v432_v53 }
 0x207   :  { %v362_v55 = vpop.permute.xlu0 %361 }
 0x208   :  { %1051 = vmatpush.xpose.msk.msrb.mxu0 %vm154_vm1, %v362_v55 }
 0x209   :  { %v1472_v56 = vpop.f32.mrf.mxu1 }
 0x20a   :  { %v435_v57 = vsel %vm431_vm2, %v1472_v56, -inf }
 0x20b   :  { %436 = vmax.xlane.f32.xlu1 %v435_v57  ;;  %1052 = vmatmul.msk.f32.vlgmr.msrb.gmra.mxu0 %vm154_vm1, %v1435_v35 }
 0x20c   :  { %704 = vmatpush.msra.mxu0 %v1099_v54 }
 0x20f   :  { %v292_v58 = vpop.permute.xlu0 %291 }
 0x210   :  { %1043 = vmatpush.xpose.msk.msra.mxu2 %vm154_vm1, %v292_v58 }
 0x213   :  { %v215_v59 = vpop.f32.mrf.mxu3  ;;  %1044 = vmatmul.msk.f32.vlgmr.msra.gmra.mxu2 %vm154_vm1, %v1378_v14  ;;  %1053 = vmatmul.msk.f32.gmra.mxu0 %vm154_vm1, %v1403_v24 }
 0x214   :  { %v438_v60 = vsel %vm431_vm2, %v215_v59, -inf }
 0x215   :  { %439 = vmax.xlane.f32.xlu1 %v438_v60 }
 0x217   :  { %v1103_v61 = vpop.permute.xlu0 %1102 }
 0x218   :  { %v1105_v62 = vunpack.i.h.bf16 %v1103_v61  ;;  %v1104_v63 = vunpack.i.l.bf16 %v1103_v61 }
 0x21a   :  { %705 = vmatpush.msra.mxu0 %v1104_v63  ;;  %740 = vmatpush.msrb.mxu1 %v1105_v62 }
 0x21b   :  { %1045 = vmatmul.msk.f32.gmra.mxu2 %vm154_vm1, %v1380_v16  ;;  %v1487_v5 = vpop.f32.mrf.mxu3 }
 0x21c   :  { %v441_v44 = vsel %vm431_vm2, %v1487_v5, -inf }
 0x21f   :  { %v1108_v0 = vpop.permute.xlu0 %1107 }
 0x220   :  { %v1109_v1 = vunpack.i.l.bf16 %v1108_v0  ;;  %v1110_v2 = vunpack.i.h.bf16 %v1108_v0 }
 0x222   :  { %809 = vmatpush.msra.mxu3 %v1109_v1 }
 0x224   :  { %810 = vmatpush.msra.mxu3 %v1110_v2 }
 0x227   :  { %v1490_v8 = vpop.f32.mrf.mxu3 }
 0x228   :  { %v444_v9 = vsel %vm431_vm2, %v1490_v8, -inf }
 0x22a   :  { %v285_v3 = vpop.f32.mrf.mxu1 }
 0x22b   :  { %v450_v4 = vsel %vm431_vm2, %v285_v3, -inf }
 0x22c   :  { %451 = vmax.xlane.f32.xlu2 %v450_v4 }
 0x22f   :  { %v1494_v10 = vpop.f32.mrf.mxu3 }
 0x230   :  { %v447_v29 = vsel %vm431_vm2, %v1494_v10, -inf }
 0x232   :  { %v288_v6 = vpop.f32.mrf.mxu1 }
 0x233   :  { %v453_v7 = vsel %vm431_vm2, %v288_v6, -inf }
 0x234   :  { %454 = vmax.xlane.f32.xlu2 %v453_v7 }
 0x237   :  { %v1498_v15 = vpop.f32.mrf.mxu3 }
 0x238   :  { %v462_v51 = vsel %vm431_vm2, %v1498_v15, -inf }
 0x23c   :  { %445 = vmax.xlane.f32.xlu2 %v444_v9 }
 0x23f   :  { %v1504_v19 = vpop.f32.mrf.mxu3 }
 0x240   :  { %v465_v20 = vsel %vm431_vm2, %v1504_v19, -inf }
 0x254   :  { %v1496_v12 = vpop.f32.mrf.mxu1 }
 0x255   :  { %v474_v48 = vsel %vm431_vm2, %v1496_v12, -inf }
 0x25c   :  { %v1500_v17 = vpop.f32.mrf.mxu1 }
 0x25d   :  { %v477_v18 = vsel %vm431_vm2, %v1500_v17, -inf }
 0x25e   :  { %478 = vmax.xlane.f32.xlu2 %v477_v18 }
 0x266   :  { %466 = vmax.xlane.f32.xlu2 %v465_v20 }
 0x276   :  { %v434_v0 = vpop.xlane.xlu0 %433 }
 0x27e   :  { %1112 = vrot.lane.b32.xlu2 %v1111_v21, %s1308_s12  ;;  %v1512_v26 = vpop.xlane.xlu1 %436 }
 0x288   :  { %v390_v22 = vpop.f32.mrf.mxu0  ;;  %v440_v30 = vpop.xlane.xlu1 %439 }
 0x289   :  { %v468_v23 = vsel %vm431_vm2, %v390_v22, -inf  ;;  %v482_v31 = vsub.f32 %v215_v59, %v440_v30 }
 0x28a   :  { %469 = vmax.xlane.f32.xlu1 %v468_v23 }
 0x28b   :  { %v500_v24 = vmul.f32 1.442695, %v482_v31 }
 0x28d   :  { %1133 = vpow2.f32 %v500_v24 }
 0x290   :  { %v393_v27 = vpop.f32.mrf.mxu0 }
 0x291   :  { %v471_v28 = vsel %vm431_vm2, %v393_v27, -inf }
 0x292   :  { %472 = vmax.xlane.f32.xlu1 %v471_v28 }
 0x293   :  { %v1525_v40 = vpop.eup %1133 }
 0x294   :  { %v534_v42 = vsel %vm431_vm2, %v1525_v40, 0.0 }
 0x296   :  { %v1515_v32 = vpop.f32.mrf.mxu2 }
 0x297   :  { %v456_v33 = vsel %vm431_vm2, %v1515_v32, -inf }
 0x298   :  { %457 = vmax.xlane.f32.xlu0 %v456_v33 }
 0x29a   :  { %448 = vmax.xlane.f32.xlu1 %v447_v29 }
 0x29e   :  { %v1521_v36 = vpop.f32.mrf.mxu2 }
 0x29f   :  { %v452_v34 = vpop.xlane.xlu2 %451  ;;  %v459_v38 = vsel %vm431_vm2, %v1521_v36, -inf }
 0x2a0   :  { %v486_v37 = vsub.f32 %v285_v3, %v452_v34  ;;  %460 = vmax.xlane.f32.xlu0 %v459_v38 }
 0x2a2   :  { %v508_v39 = vmul.f32 1.442695, %v486_v37 }
 0x2a4   :  { %1135 = vpow2.f32 %v508_v39 }
 0x2a7   :  { %v455_v41 = vpop.xlane.xlu2 %454  ;;  %535 = vadd.xlane.f32.xlu2 %v534_v42 }
 0x2a8   :  { %v487_v43 = vsub.f32 %v288_v6, %v455_v41  ;;  %442 = vmax.xlane.f32.xlu0 %v441_v44 }
 0x2aa   :  { %v1531_v45 = vpop.eup %1135  ;;  %v510_v46 = vmul.f32 1.442695, %v487_v43 }
 0x2ab   :  { %v546_v47 = vsel %vm431_vm2, %v1531_v45, 0.0 }
 0x2ac   :  { %1137 = vpow2.f32 %v510_v46  ;;  %547 = vadd.xlane.f32.xlu1 %v546_v47 }
 0x2af   :  { %v446_v53 = vpop.xlane.xlu2 %445 }
 0x2b0   :  { %475 = vmax.xlane.f32.xlu0 %v474_v48  ;;  %v484_v62 = vsub.f32 %v1490_v8, %v446_v53 }
 0x2b2   :  { %v1537_v49 = vpop.eup %1137  ;;  %v504_v1 = vmul.f32 1.442695, %v484_v62 }
 0x2b3   :  { %v549_v50 = vsel %vm431_vm2, %v1537_v49, 0.0 }
 0x2b4   :  { %550 = vadd.xlane.f32.xlu2 %v549_v50 }
 0x2b8   :  { %463 = vmax.xlane.f32.xlu0 %v462_v51 }
 0x2d1   :  { %v479_v54 = vpop.xlane.xlu2 %478 }
 0x2d2   :  { %v495_v8 = vsub.f32 %v1500_v17, %v479_v54 }
 0x2d9   :  { %v1543_v55 = vpop.xlane.xlu2 %466 }
 0x2e1   :  { %v1113_v57 = vpop.permute.xlu2 %1112 }
 0x2e2   :  { %v1115_v58 = vunpack.i.h.bf16 %v1113_v57  ;;  %v1114_v59 = vunpack.i.l.bf16 %v1113_v57 }
 0x2e4   :  { %844 = vmatpush.msrb.mxu0 %v1114_v59  ;;  %879 = vmatpush.msra.mxu1 %v1115_v58 }
 0x2fd   :  { %v470_v60 = vpop.xlane.xlu1 %469 }
 0x2fe   :  { %v492_v61 = vsub.f32 %v390_v22, %v470_v60  ;;  %v526_v22 = vmul.f32 1.442695, %v495_v8 }
 0x300   :  { %v520_v63 = vmul.f32 1.442695, %v492_v61 }
 0x302   :  { %1139 = vpow2.f32 %v520_v63 }
 0x303   :  { %1141 = vpow2.f32 %v504_v1  ;;  %v1126_v1 = vpack.i.bf16 %v1378_v14, %v1380_v16 }
 0x305   :  { %v473_v2 = vpop.xlane.xlu1 %472 }
 0x306   :  { %v493_v4 = vsub.f32 %v393_v27, %v473_v2  ;;  %v1121_v2 = vpack.i.bf16 %v1373_v13, %v1367_v11 }
 0x308   :  { %v1546_v3 = vpop.eup %1139  ;;  %v522_v9 = vmul.f32 1.442695, %v493_v4  ;;  %v481_v4 = vsub.f32 %v1472_v56, %v1512_v26 }
 0x309   :  { %v564_v6 = vsel %vm431_vm2, %v1546_v3, 0.0  ;;  %v1552_v18 = vpop.eup %1141 }
 0x30a   :  { %565 = vadd.xlane.f32.xlu1 %v564_v6  ;;  %1143 = vpow2.f32 %v522_v9  ;;  %v540_v20 = vsel %vm431_vm2, %v1552_v18, 0.0 }
 0x30b   :  { %v1550_v7 = vpop.xlane.xlu0 %457  ;;  %1145 = vpow2.f32 %v526_v22 }
 0x30c   :  { %v488_v11 = vsub.f32 %v1515_v32, %v1550_v7 }
 0x30d   :  { %v449_v27 = vpop.xlane.xlu1 %448 }
 0x30e   :  { %v485_v24 = vsub.f32 %v1494_v10, %v449_v27  ;;  %v480_v10 = vsub.f32 %v1467_v52, %v434_v0  ;;  %v512_v56 = vmul.f32 1.442695, %v488_v11 }
 0x310   :  { %v1559_v23 = vpop.eup %1143  ;;  %v506_v39 = vmul.f32 1.442695, %v485_v24 }
 0x311   :  { %v567_v28 = vsel %vm431_vm2, %v1559_v23, 0.0  ;;  %v1564_v33 = vpop.eup %1145 }
 0x312   :  { %541 = vadd.xlane.f32.xlu1 %v540_v20  ;;  %v573_v38 = vsel %vm431_vm2, %v1564_v33, 0.0 }
 0x313   :  { %v1557_v21 = vpop.xlane.xlu0 %460 }
 0x31a   :  { %v536_v30 = vpop.xlane.xlu2 %535  ;;  %568 = vadd.xlane.f32.xlu1 %v567_v28 }
 0x31b   :  { %1147 = vrcp.f32 %v536_v30  ;;  %v443_v31 = vpop.xlane.xlu0 %442 }
 0x31c   :  { %v483_v17 = vsub.f32 %v1487_v5, %v443_v31 }
 0x31e   :  { %v502_v29 = vmul.f32 1.442695, %v483_v17 }
 0x31f   :  { %v548_v34 = vpop.xlane.xlu1 %547 }
 0x320   :  { %1149 = vrcp.f32 %v548_v34 }
 0x321   :  { %1151 = vpow2.f32 %v502_v29  ;;  %v1148_v37 = vpop.eup %1147 }
 0x322   :  { %v594_v41 = vmul.f32 %v1148_v37, %v1525_v40  ;;  %574 = vadd.xlane.f32.xlu1 %v573_v38  ;;  %1153 = vpow2.f32 %v506_v39 }
 0x323   :  { %v476_v42 = vpop.xlane.xlu0 %475 }
 0x324   :  { %v494_v43 = vsub.f32 %v1496_v12, %v476_v42  ;;  %1060 = vmatmul.msk.f32.vlgmr.msrb.gmra.mxu3 %vm431_vm2, %v594_v41  ;;  %v496_v12 = vmul.f32 1.442695, %v480_v10 }
 0x326   :  { %v1150_v5 = vpop.eup %1149  ;;  %v524_v47 = vmul.f32 1.442695, %v494_v43 }
 0x327   :  { %v1572_v44 = vpop.eup %1151  ;;  %v598_v46 = vmul.f32 %v1150_v5, %v1531_v45  ;;  %v551_v48 = vpop.xlane.xlu2 %550  ;;  %v491_v45 = vsub.f32 %v1504_v19, %v1543_v55  ;;  %v1116_v55 = vpack.i.bf16 %v1409_v25, %v1435_v35  ;;  %v498_v25 = vmul.f32 1.442695, %v481_v4 }
 0x328   :  { %1155 = vrcp.f32 %v551_v48  ;;  %v537_v40 = vsel %vm431_vm2, %v1572_v44, 0.0  ;;  %v1579_v51 = vpop.eup %1153  ;;  %v489_v35 = vsub.f32 %v1521_v36, %v1557_v21 }
 0x329   :  { %1157 = vpow2.f32 %v524_v47  ;;  %538 = vadd.xlane.f32.xlu0 %v537_v40  ;;  %1064 = vmatmul.msk.f32.vlgmr.msrb.gmra.mxu1 %vm431_vm2, %v598_v46  ;;  %v543_v59 = vsel %vm431_vm2, %v1579_v51, 0.0 }
 0x32a   :  { %1159 = vpow2.f32 %v496_v12  ;;  %v514_v6 = vmul.f32 1.442695, %v489_v35 }
 0x32b   :  { %v464_v50 = vpop.xlane.xlu0 %463 }
 0x32c   :  { %v490_v53 = vsub.f32 %v1498_v15, %v464_v50  ;;  %v518_v15 = vmul.f32 1.442695, %v491_v45 }
 0x32e   :  { %v1156_v52 = vpop.eup %1155  ;;  %v516_v57 = vmul.f32 1.442695, %v490_v53 }
 0x32f   :  { %v1582_v54 = vpop.eup %1157  ;;  %v599_v58 = vmul.f32 %v1156_v52, %v1537_v49 }
 0x330   :  { %v570_v60 = vsel %vm431_vm2, %v1582_v54, 0.0  ;;  %1161 = vpow2.f32 %v516_v57  ;;  %v1592_v61 = vpop.eup %1159 }
 0x331   :  { %544 = vadd.xlane.f32.xlu0 %v543_v59  ;;  %571 = vadd.xlane.f32.xlu2 %v570_v60  ;;  %1163 = vpow2.f32 %v518_v15  ;;  %v528_v19 = vsel %vm431_vm2, %v1592_v61, 0.0 }
 0x332   :  { %1065 = vmatmul.msk.f32.gmra.mxu1 %vm431_vm2, %v599_v58  ;;  %1165 = vpow2.f32 %v498_v25 }
 0x333   :  { %1167 = vpow2.f32 %v514_v6 }
 0x334   :  { %1169 = vpow2.f32 %v512_v56  ;;  %v951_v56 = vld [vmem:[#allocation7 + $0x10] sm:$0xff] }
 0x336   :  { %v1594_v62 = vpop.eup %1161 }
 0x337   :  { %v558_v49 = vsel %vm431_vm2, %v1594_v62, 0.0  ;;  %v1603_v63 = vpop.eup %1163 }
 0x338   :  { %v561_v0 = vsel %vm431_vm2, %v1603_v63, 0.0  ;;  %v1617_v9 = vpop.eup %1165 }
 0x339   :  { %529 = vadd.xlane.f32.xlu2 %v528_v19  ;;  %559 = vadd.xlane.f32.xlu0 %v558_v49  ;;  %v531_v14 = vsel %vm431_vm2, %v1617_v9, 0.0  ;;  %v1621_v16 = vpop.eup %1167 }
 0x33a   :  { %v555_v13 = vsel %vm431_vm2, %v1621_v16, 0.0  ;;  %v1627_v26 = vpop.eup %1169 }
 0x33b   :  { %1117 = vrot.lane.b32.xlu1 %v1116_v55, %s1308_s12  ;;  %v552_v8 = vsel %vm431_vm2, %v1627_v26, 0.0 }
 0x341   :  { %562 = vadd.xlane.f32.xlu0 %v561_v0 }
 0x351   :  { %1127 = vrot.lane.b32.xlu2 %v1126_v1, %s1308_s12 }
 0x355   :  { %1122 = vrot.lane.b32.xlu0 %v1121_v2, %s1308_s12 }
 0x365   :  { %532 = vadd.xlane.f32.xlu1 %v531_v14 }
 0x36d   :  { %556 = vadd.xlane.f32.xlu1 %v555_v13  ;;  %v952_v13 = vld [vmem:[#allocation7 + $0x18] sm:$0xff] }
 0x37d   :  { %v566_v36 = vpop.xlane.xlu1 %565 }
 0x37f   :  { %553 = vadd.xlane.f32.xlu0 %v552_v8 }
 0x385   :  { %v542_v20 = vpop.xlane.xlu1 %541 }
 0x386   :  { %1171 = vrcp.f32 %v542_v20 }
 0x38c   :  { %v1172_v21 = vpop.eup %1171 }
 0x38d   :  { %v596_v22 = vmul.f32 %v1172_v21, %v1552_v18  ;;  %v569_v32 = vpop.xlane.xlu1 %568 }
 0x38f   :  { %1062 = vmatmul.msk.f32.vlgmr.msra.gmra.mxu0 %vm431_vm2, %v596_v22 }
 0x395   :  { %v575_v17 = vpop.xlane.xlu1 %574 }
 0x39c   :  { %v539_v7 = vpop.xlane.xlu0 %538 }
 0x39d   :  { %1173 = vrcp.f32 %v539_v7 }
 0x3a3   :  { %v1174_v27 = vpop.eup %1173 }
 0x3a4   :  { %v572_v28 = vpop.xlane.xlu2 %571  ;;  %v545_v30 = vpop.xlane.xlu0 %544  ;;  %v595_v31 = vmul.f32 %v1174_v27, %v1572_v44 }
 0x3a5   :  { %1175 = vrcp.f32 %v545_v30 }
 0x3a6   :  { %1061 = vmatmul.msk.f32.gmra.mxu3 %vm431_vm2, %v595_v31  ;;  %v742_v24 = vpop.f32.mrf.mxu1  ;;  %1177 = vrcp.f32 %v572_v28 }
 0x3a7   :  { %924 = vrot.lane.b32.xlu1 %v742_v24, %s1309_s13  ;;  %v672_v18 = vpop.f32.mrf.mxu3  ;;  %1179 = vrcp.f32 %v566_v36  ;;  %v949_v36 = vld [vmem:[#allocation7] sm:$0xff] }
 0x3a8   :  { %892 = vrot.lane.b32.xlu2 %v672_v18, %s1301_s27 }
 0x3ab   :  { %v1176_v29 = vpop.eup %1175 }
 0x3ac   :  { %v560_v34 = vpop.xlane.xlu0 %559  ;;  %v1178_v37 = vpop.eup %1177  ;;  %v597_v38 = vmul.f32 %v1176_v29, %v1579_v51 }
 0x3ad   :  { %1181 = vrcp.f32 %v560_v34  ;;  %v1118_v39 = vpop.permute.xlu1 %1117  ;;  %v606_v43 = vmul.f32 %v1178_v37, %v1582_v54  ;;  %v1180_v5 = vpop.eup %1179 }
 0x3ae   :  { %1183 = vrcp.f32 %v575_v17  ;;  %v1120_v41 = vunpack.i.h.bf16 %v1118_v39  ;;  %v1119_v42 = vunpack.i.l.bf16 %v1118_v39  ;;  %1063 = vmatmul.msk.f32.gmra.mxu0 %vm431_vm2, %v597_v38  ;;  %v604_v47 = vmul.f32 %v1180_v5, %v1546_v3  ;;  %v530_v52 = vpop.xlane.xlu2 %529 }
 0x3af   :  { %1185 = vrcp.f32 %v569_v32  ;;  %v745_v2 = vpop.f32.mrf.mxu1 }
 0x3b0   :  { %845 = vmatpush.msrb.mxu0 %v1119_v42  ;;  %880 = vmatpush.msra.mxu1 %v1120_v41 }
 0x3b1   :  { %1072 = vmatmul.msk.f32.vlgmr.msra.gmra.mxu1 %vm431_vm2, %v606_v43 }
 0x3b3   :  { %v1182_v44 = vpop.eup %1181 }
 0x3b4   :  { %v563_v10 = vpop.xlane.xlu0 %562  ;;  %v1184_v46 = vpop.eup %1183  ;;  %v602_v48 = vmul.f32 %v1182_v44, %v1594_v62 }
 0x3b5   :  { %1187 = vrcp.f32 %v563_v10  ;;  %v607_v40 = vmul.f32 %v1184_v46, %v1564_v33  ;;  %v1186_v12 = vpop.eup %1185 }
 0x3b6   :  { %1068 = vmatmul.msk.f32.vlgmr.msra.gmra.mxu3 %vm431_vm2, %v602_v48  ;;  %1070 = vmatmul.msk.f32.vlgmr.msrb.gmra.mxu0 %vm431_vm2, %v604_v47  ;;  %v605_v53 = vmul.f32 %v1186_v12, %v1559_v23  ;;  %1189 = vrcp.f32 %v530_v52  ;;  %v1128_v57 = vpop.permute.xlu2 %1127  ;;  %v1132_v12 = vld [vmem:[%s1698_s4] ss:$0 sm:$0xff] }
 0x3b7   :  { %v1129_v59 = vunpack.i.l.bf16 %v1128_v57  ;;  %v1130_v60 = vunpack.i.h.bf16 %v1128_v57 }
 0x3b9   :  { %1073 = vmatmul.msk.f32.gmra.mxu1 %vm431_vm2, %v607_v40 }
 0x3bb   :  { %v1188_v50 = vpop.eup %1187 }
 0x3bc   :  { %v603_v51 = vmul.f32 %v1188_v50, %v1603_v63  ;;  %v1190_v54 = vpop.eup %1189 }
 0x3bd   :  { %v592_v58 = vmul.f32 %v1190_v54, %v1592_v61 }
 0x3be   :  { %1069 = vmatmul.msk.f32.gmra.mxu3 %vm431_vm2, %v603_v51  ;;  %1071 = vmatmul.msk.f32.gmra.mxu0 %vm431_vm2, %v605_v53 }
 0x3c7   :  { %v1123_v3 = vpop.permute.xlu0 %1122 }
 0x3c8   :  { %v1124_v45 = vunpack.i.l.bf16 %v1123_v3  ;;  %v1125_v33 = vunpack.i.h.bf16 %v1123_v3 }
 0x3ca   :  { %634 = vmatpush.msrb.mxu2 %v1124_v45 }
 0x3cc   :  { %635 = vmatpush.msrb.mxu2 %v1125_v33 }
 0x3cd   :  { %1058 = vmatmul.msk.f32.vlgmr.msrb.gmra.mxu2 %vm431_vm2, %v592_v58 }
 0x3ce   :  { %774 = vmatpush.msra.mxu2 %v1129_v59 }
 0x3d0   :  { %775 = vmatpush.msra.mxu2 %v1130_v60 }
 0x3d2   :  { %981 = vmatpush.msrb.mxu2 %v952_v13 }
 0x3d4   :  { %982 = vmatpush.msrb.mxu2 %v951_v56 }
 0x3d8   :  { %v533_v23 = vpop.xlane.xlu1 %532 }
 0x3d9   :  { %1191 = vrcp.f32 %v533_v23 }
 0x3df   :  { %v1192_v15 = vpop.eup %1191 }
 0x3e0   :  { %v593_v62 = vmul.f32 %v1192_v15, %v1617_v9  ;;  %v557_v49 = vpop.xlane.xlu1 %556 }
 0x3e2   :  { %1059 = vmatmul.msk.f32.gmra.mxu2 %vm431_vm2, %v593_v62 }
 0x3f2   :  { %v554_v19 = vpop.xlane.xlu0 %553 }
 0x3f3   :  { %1193 = vrcp.f32 %v554_v19 }
 0x3f4   :  { %1195 = vrcp.f32 %v557_v49 }
 0x3f9   :  { %v1194_v55 = vpop.eup %1193 }
 0x3fa   :  { %v600_v61 = vmul.f32 %v1194_v55, %v1627_v26  ;;  %v1196_v63 = vpop.eup %1195  ;;  %v950_v26 = vld [vmem:[#allocation7 + $0x8] sm:$0xff] }
 0x3fb   :  { %v601_v0 = vmul.f32 %v1196_v63, %v1621_v16  ;;  %983 = vmatpush.msrb.mxu2 %v950_v26 }
 0x3fc   :  { %1066 = vmatmul.msk.f32.vlgmr.msra.gmra.mxu2 %vm431_vm2, %v600_v61 }
 0x3fd   :  { %984 = vmatpush.msrb.mxu2 %v949_v36 }
 0x402   :  { %v893_v8 = vpop.permute.xlu2 %892 }
 0x404   :  { %1067 = vmatmul.msk.f32.gmra.mxu2 %vm431_vm2, %v601_v0 }
 0x40c   :  { %v707_v1 = vpop.f32.mrf.mxu0 }
 0x40d   :  { %908 = vrot.lane.b32.xlu0 %v707_v1, %s1310_s14 }
 0x415   :  { %926 = vrot.lane.b32.xlu0 %v745_v2, %s1309_s13 }
 0x419   :  { %v925_v32 = vpop.permute.xlu1 %924 }
 0x429   :  { %v675_v4 = vpop.f32.mrf.mxu3 }
 0x42a   :  { %894 = vrot.lane.b32.xlu2 %v675_v4, %s1301_s27 }
 0x42b   :  { %v710_v25 = vpop.f32.mrf.mxu0 }
 0x42e   :  { %v882_v35 = vpop.f32.mrf.mxu1 }
 0x42f   :  { %928 = vrot.lane.b32.xlu0 %v882_v35, %s1309_s13 }
 0x432   :  { %910 = vrot.lane.b32.xlu2 %v710_v25, %s1310_s14 }
 0x433   :  { %v847_v6 = vpop.f32.mrf.mxu0 }
 0x434   :  { %912 = vrot.lane.b32.xlu1 %v847_v6, %s1310_s14 }
 0x436   :  { %v885_v9 = vpop.f32.mrf.mxu1 }
 0x437   :  { %930 = vrot.lane.b32.xlu0 %v885_v9, %s1309_s13 }
 0x439   :  { %v812_v14 = vpop.f32.mrf.mxu3 }
 0x43a   :  { %896 = vrot.lane.b32.xlu2 %v812_v14, %s1301_s27 }
 0x43b   :  { %v850_v16 = vpop.f32.mrf.mxu0 }
 0x43c   :  { %914 = vrot.lane.b32.xlu1 %v850_v16, %s1310_s14 }
 0x441   :  { %v815_v11 = vpop.f32.mrf.mxu3 }
 0x442   :  { %898 = vrot.lane.b32.xlu2 %v815_v11, %s1301_s27 }
 0x450   :  { %v637_v20 = vpop.f32.mrf.mxu2 }
 0x451   :  { %v936_v21 = vsel %vm154_vm1, %v637_v20, %v893_v8 }
 0x465   :  { %v640_v30 = vpop.f32.mrf.mxu2 }
 0x47f   :  { %v909_v22 = vpop.permute.xlu0 %908  ;;  %v777_v37 = vpop.f32.mrf.mxu2 }
 0x480   :  { %v940_v7 = vsel %vm431_vm2, %v936_v21, %v909_v22 }
 0x481   :  { %v945_v27 = vsel %vm944_vm3, %v940_v7, %v925_v32 }
 0x482   :  { %1074 = vmatmul.msk.f32.vlgmr.msrb.gmra.mxu2 %vm80_vm0, %v945_v27 }
 0x484   :  { %v895_v28 = vpop.permute.xlu2 %894 }
 0x485   :  { %v937_v31 = vsel %vm154_vm1, %v640_v30, %v895_v28 }
 0x487   :  { %v927_v24 = vpop.permute.xlu0 %926  ;;  %v780_v44 = vpop.f32.mrf.mxu2 }
 0x48c   :  { %v911_v17 = vpop.permute.xlu2 %910 }
 0x48d   :  { %v941_v18 = vsel %vm431_vm2, %v937_v31, %v911_v17 }
 0x48e   :  { %v946_v29 = vsel %vm944_vm3, %v941_v18, %v927_v24 }
 0x48f   :  { %1075 = vmatmul.msk.f32.gmra.mxu2 %vm80_vm0, %v946_v29 }
 0x494   :  { %v897_v34 = vpop.permute.xlu2 %896 }
 0x495   :  { %v938_v39 = vsel %vm154_vm1, %v777_v37, %v897_v34 }
 0x49c   :  { %v899_v5 = vpop.permute.xlu2 %898 }
 0x49d   :  { %v939_v10 = vsel %vm154_vm1, %v780_v44, %v899_v5 }
 0x4a1   :  { %v929_v38 = vpop.permute.xlu0 %928 }
 0x4a6   :  { %v913_v41 = vpop.permute.xlu1 %912 }
 0x4a7   :  { %v942_v42 = vsel %vm431_vm2, %v938_v39, %v913_v41 }
 0x4a8   :  { %v947_v43 = vsel %vm944_vm3, %v942_v42, %v929_v38 }
 0x4a9   :  { %1076 = vmatmul.msk.f32.gmra.mxu2 %vm80_vm0, %v947_v43  ;;  %v931_v47 = vpop.permute.xlu0 %930 }
 0x4ae   :  { %v915_v46 = vpop.permute.xlu1 %914 }
 0x4af   :  { %v943_v48 = vsel %vm431_vm2, %v939_v10, %v915_v46 }
 0x4b0   :  { %v948_v40 = vsel %vm944_vm3, %v943_v48, %v931_v47 }
 0x4b1   :  { %1077 = vmatmul.msk.f32.gmra.mxu2 %vm80_vm0, %v948_v40 }
 0x505   :  { %v986_v50 = vpop.f32.mrf.mxu2 }
 0x506   :  { %v987_v51 = vadd.f32 %v1132_v12, %v986_v50 }
 0x508   :  { %998 = vst.msk [vmem:[#allocation8] sm:$0xff] %vm80_vm0, %v987_v51 }
 0x512   :  { %v989_v53 = vpop.f32.mrf.mxu2 }
 0x513   :  { %v990_v52 = vadd.f32 %v1132_v12, %v989_v53 }
 0x515   :  { %999 = vst.msk [vmem:[#allocation8 + $0x8] sm:$0xff] %vm80_vm0, %v990_v52 }
 0x52c   :  { %v992_v3 = vpop.f32.mrf.mxu2 }
 0x52d   :  { %v993_v54 = vadd.f32 %v1132_v12, %v992_v3 }
 0x52f   :  { %1000 = vst.msk [vmem:[#allocation8 + $0x10] sm:$0xff] %vm80_vm0, %v993_v54 }
 0x534   :  { %v995_v45 = vpop.f32.mrf.mxu2 }
 0x535   :  { %v996_v57 = vadd.f32 %v1132_v12, %v995_v45 }
 0x537   :  { %1001 = vst.msk [vmem:[#allocation8 + $0x18] sm:$0xff] %vm80_vm0, %v996_v57 }
 0x538   :  { %1014 = dma.vmem_to_hbm [thread:$0]  %s1007_s18, 512, %s1009_s21, [#allocation4], %s1300_s26, %s1300_s26, %s1301_s27  }
 0x539   :  { %1297 = dma.done.wait [#allocation4], 512  }
 0x53a   :  { %1298 = vsyncadd [#allocation4], 4294966784 }
 0x53b   :  { %1019 = vsyncpa [#allocation3], 1 }
 0x53c   :  { %1020 = vsyncpa [#allocation6], 1 }
 0x53d   :  { %1021 = vsyncpa [#allocation4], 1 }

</bundles_post_ra>
